<compile_context>
chip_gen: v5e
topology: v5e:2x2
jax: 0.10.0
libtpu: 0.0.40
codegen_flags: <defaults>
</compile_context>

<pallas_src>
import functools
import math

import jax
import jax.numpy as jnp
from jax.experimental import pallas as pl
from jax.experimental.pallas import tpu as pltpu

_LANES = 512          # lane-dense: multiple of 128 lanes
_SUBLANES = 8         # f32 vreg sublane count
_ROW_ALIGN = 16       # row-tile alignment (also covers bf16 sublane packing)
_MAX_ROW_TILE = 1024  # 1024 x 512 x 4B = 2 MiB block; x2 double-buffer = 4 MiB
_MIN_PALLAS_ELEMS = _SUBLANES * 128  # below ~1 vreg, plain XLA is already optimal


def _round_up(x: int, m: int) -> int:
    return (x + m - 1) // m * m


def _sumsq_kernel(x_ref, out_ref, acc_ref):
    """Grid axis 0 walks row tiles of a [rows, _LANES] slab.

    acc_ref is a vreg-shaped (8, _LANES) f32 accumulator: the per-step work is
    a pure-VPU square + vreg add; the cross-lane/sublane reduce is deferred to
    the final grid step only.
    """
    i = pl.program_id(0)

    @pl.when(i == 0)
    def _():
        acc_ref[...] = jnp.zeros_like(acc_ref)

    x = x_ref[...].astype(jnp.float32)            # (row_tile, _LANES)
    sq = x * x
    # Fold groups of 8 sublanes onto the (8, _LANES) accumulator (VPU-only adds;
    # the reshape stays within (8,128) tile boundaries -> no data movement).
    acc_ref[...] += jnp.sum(sq.reshape(-1, _SUBLANES, sq.shape[-1]), axis=0)

    # Final cross-lane/sublane reduce + scalar store only once.
    @pl.when(i == pl.num_programs(0) - 1)
    def _():
        out_ref[...] = jnp.sum(acc_ref[...]).reshape(1, 1)


@functools.partial(jax.jit, static_argnames=("row_tile",))
def _sum_of_squares(x2d: jax.Array, row_tile: int) -> jax.Array:
    """Pallas reduction: sum(x**2) over a lane-dense 2-D [rows, _LANES] slab."""
    rows, lanes = x2d.shape
    grid = (rows // row_tile,)
    out = pl.pallas_call(
        _sumsq_kernel,
        out_shape=jax.ShapeDtypeStruct((1, 1), jnp.float32),
        grid_spec=pltpu.PrefetchScalarGridSpec(
            num_scalar_prefetch=0,
            grid=grid,
            in_specs=[pl.BlockSpec((row_tile, lanes), lambda i: (i, 0))],
            out_specs=pl.BlockSpec((1, 1), lambda i: (0, 0)),
            scratch_shapes=[pltpu.VMEM((_SUBLANES, lanes), jnp.float32)],
        ),
        compiler_params=pltpu.CompilerParams(
            dimension_semantics=("arbitrary",),     # reduction axis
            vmem_limit_bytes=32 * 1024 * 1024,      # block (~4 MiB dbl-buffered) fits all gens
        ),
    )(x2d)
    return out[0, 0]


def _pack_embeddings(embeddings_dict: dict):
    """Flatten + concat all tensors into one lane-dense, zero-padded 2-D slab.

    Returns (slab, row_tile) where slab.shape = (padded_rows, _LANES) and
    padded_rows % row_tile == 0.  Zero padding does not change sum(x**2).
    """
    items = sorted(embeddings_dict.items())
    flats = [emb.reshape(-1) for _, emb in items]
    dtype = jnp.result_type(*[f.dtype for f in flats])   # bf16 stays bf16 (halves HBM traffic)
    flat = jnp.concatenate([f.astype(dtype) for f in flats])

    total = flat.shape[0]
    rows = -(-total // _LANES)                            # ceil-div
    row_tile = min(_MAX_ROW_TILE, _round_up(rows, _ROW_ALIGN))
    padded_rows = _round_up(max(rows, 1), row_tile)
    pad = padded_rows * _LANES - total
    if pad:
        flat = jnp.pad(flat, (0, pad))
    return flat.reshape(padded_rows, _LANES), row_tile


class BaseRegularizer:
    """JAX/Pallas port of PyTorchCML's BaseRegularizer.

    forward(embeddings_dict) -> scalar regularization term:
        weight * sum over all embeddings of Frobenius-norm squared.
    """

    def __init__(self, weight: float = 0.01):
        self.weight = weight

    def forward(self, embeddings_dict: dict) -> jax.Array:
        if not embeddings_dict:
            return jnp.float32(0.0)

        total_elems = sum(int(math.prod(e.shape)) for e in embeddings_dict.values())
        if total_elems < _MIN_PALLAS_ELEMS:
            # Tiny tables: pallas_call launch/pipeline overhead exceeds the whole
            # reduction; XLA's fused reduce is already at roofline there.
            total = sum(
                jnp.sum(jnp.square(e.astype(jnp.float32)))
                for e in embeddings_dict.values()
            )
            return jnp.float32(self.weight) * total

        slab, row_tile = _pack_embeddings(embeddings_dict)
        return jnp.float32(self.weight) * _sum_of_squares(slab, row_tile)


if __name__ == "__main__":
    key = jax.random.PRNGKey(0)
    k_user, k_item = jax.random.split(key)

    # small-but-kernel-exercising shapes consistent with embedding tables [N, D]
    user_embedding = jax.random.normal(k_user, (64, 128), dtype=jnp.float32)
    item_embedding = jax.random.normal(k_item, (48, 96), dtype=jnp.float32)
    embeddings_dict = {
        "user_embedding": user_embedding,
        "item_embedding": item_embedding,
    }

    reg = BaseRegularizer(weight=0.01)
    out = jax.block_until_ready(reg.forward(embeddings_dict))

    # reference check (plain JAX)
    ref = 0.01 * (jnp.sum(user_embedding ** 2) + jnp.sum(item_embedding ** 2))
    assert jnp.allclose(out, ref, rtol=1e-4, atol=1e-4), (out, ref)

    print("KERNEL_OK")
</pallas_src>

<mosaic_0001>
module attributes {stable_mosaic.version = 11 : i64} {
  func.func @_sumsq_kernel(%arg0: i32, %arg1: memref<32x512xf32, #tpu.memory_space<vmem>>, %arg2: memref<1x1xf32, #tpu.memory_space<vmem>>, %arg3: memref<8x512xf32, #tpu.memory_space<vmem>>) attributes {dimension_semantics = [#tpu.dimension_semantics<arbitrary>], iteration_bounds = array<i64: 1>, scalar_prefetch = 0 : i64, scratch_operands = 1 : i64, tpu.core_type = #tpu.core_type<tc>, window_params = [{transform_indices = @transform_0, window_bounds = array<i64: 32, 512>}, {pipeline_mode = #tpu.pipeline_mode<synchronous>, transform_indices = @transform_1, window_bounds = array<i64: 1, 1>}]} {
    %c0_i32 = arith.constant 0 : i32
    %0 = arith.cmpi eq, %arg0, %c0_i32 : i32
    %1 = arith.extui %0 : i1 to i32
    %c0_i32_0 = arith.constant 0 : i32
    %2 = arith.cmpi ne, %1, %c0_i32_0 : i32
    scf.if %2 {
      %cst_8 = arith.constant 0.000000e+00 : f32
      %13 = vector.broadcast %cst_8 : f32 to vector<8x512xf32>
      %c0_9 = arith.constant 0 : index
      %c0_10 = arith.constant 0 : index
      %14 = vector.load %arg3[%c0_9, %c0_10] : memref<8x512xf32, #tpu.memory_space<vmem>>, vector<8x512xf32>
      tpu.vector_store %arg3[%c0_9, %c0_10], %13 {strides = array<i32>} : memref<8x512xf32, #tpu.memory_space<vmem>>, vector<8x512xf32>,
    } else {
    }
    %c0 = arith.constant 0 : index
    %c0_1 = arith.constant 0 : index
    %3 = vector.load %arg1[%c0, %c0_1] : memref<32x512xf32, #tpu.memory_space<vmem>>, vector<32x512xf32>
    %4 = arith.mulf %3, %3 : vector<32x512xf32>
    %c0_2 = arith.constant 0 : index
    %c0_3 = arith.constant 0 : index
    %5 = vector.load %arg3[%c0_2, %c0_3] : memref<8x512xf32, #tpu.memory_space<vmem>>, vector<8x512xf32>
    %6 = vector.shape_cast %4 : vector<32x512xf32> to vector<4x8x512xf32>
    %cst = arith.constant dense<0.000000e+00> : vector<8x512xf32>
    %7 = vector.multi_reduction <add>, %6, %cst [0] : vector<4x8x512xf32> to vector<8x512xf32>
    %8 = arith.addf %5, %7 : vector<8x512xf32>
    %c0_4 = arith.constant 0 : index
    %c0_5 = arith.constant 0 : index
    %9 = vector.load %arg3[%c0_4, %c0_5] : memref<8x512xf32, #tpu.memory_space<vmem>>, vector<8x512xf32>
    tpu.vector_store %arg3[%c0_4, %c0_5], %8 {strides = array<i32>} : memref<8x512xf32, #tpu.memory_space<vmem>>, vector<8x512xf32>,
    %c0_i32_6 = arith.constant 0 : i32
    %10 = arith.cmpi eq, %arg0, %c0_i32_6 : i32
    %11 = arith.extui %10 : i1 to i32
    %c0_i32_7 = arith.constant 0 : i32
    %12 = arith.cmpi ne, %11, %c0_i32_7 : i32
    scf.if %12 {
      %c0_8 = arith.constant 0 : index
      %c0_9 = arith.constant 0 : index
      %13 = vector.load %arg3[%c0_8, %c0_9] : memref<8x512xf32, #tpu.memory_space<vmem>>, vector<8x512xf32>
      %14 = vector.shape_cast %13 : vector<8x512xf32> to vector<1x8x512xf32>
      %cst_10 = arith.constant dense<0.000000e+00> : vector<1xf32>
      %15 = vector.multi_reduction <add>, %14, %cst_10 [1, 2] : vector<1x8x512xf32> to vector<1xf32>
      %16 = vector.shape_cast %15 : vector<1xf32> to vector<1x1x1xf32>
      %17 = vector.extract %16[0, 0, 0] : f32 from vector<1x1x1xf32>
      %18 = vector.broadcast %17 : f32 to vector<1x1xf32>
      %c0_11 = arith.constant 0 : index
      %c0_12 = arith.constant 0 : index
      %19 = vector.load %arg2[%c0_11, %c0_12] : memref<1x1xf32, #tpu.memory_space<vmem>>, vector<1x1xf32>
      tpu.vector_store %arg2[%c0_11, %c0_12], %18 {strides = array<i32>} : memref<1x1xf32, #tpu.memory_space<vmem>>, vector<1x1xf32>,
    } else {
    }
    return
  }
  func.func @transform_0(%arg0: i32) -> (i32, i32) {
    %c0_i32 = arith.constant 0 : i32
    %c0_i32_0 = arith.constant 0 : i32
    return %arg0, %c0_i32 : i32, i32
  }
  func.func @transform_1(%arg0: i32) -> (i32, i32) {
    %c0_i32 = arith.constant 0 : i32
    %c0_i32_0 = arith.constant 0 : i32
    %c0_i32_1 = arith.constant 0 : i32
    return %c0_i32, %c0_i32_0 : i32, i32
  }
}

</mosaic_0001>

<bundles_post_ra>
// kernel: _sum_of_squares.1
= control target key start
LH: loop header
LB: loop body
LE: loop exit
PB: predicated region body
PF: predicated region fallthrough
CT: control target
= control target key end

     0   :  { %6 = vsyncpa [#allocation4], 0  ;;  %s206_s0 = inlined_call_operand.hbm [shape: f32[32,512], index: 0, kind: input, shape index: {}]   ;;  %s207_s1 = inlined_call_operand.hbm [shape: f32[1,1], index: 1, kind: output, shape index: {}]  }
   0x1   :  { %7 = vsyncpa [#allocation5], 0  ;;  %s12_s8 = sshll.u32 %s206_s0, 4  ;;  %s186_s9 = smov [#allocation3]   ;;  %s13_s8 = int_to_ptr.hbm [resolvable:$true] %s12_s8 }
   0x2   :  { %s14_s10 = sshll.u32 %s186_s9, 4  ;;  %s187_s11 = smov 512   ;;  %s15_s10 = int_to_ptr.vmem [resolvable:$true] %s14_s10 }
   0x3   :  { %s188_s12 = smov 32  }
   0x4   :  { %20 = dma.hbm_to_vmem [thread:$0]  %s13_s8, 2048, %s15_s10, [#allocation4], %s187_s11, %s187_s11, %s188_s12  }
   0x5   :  { %182 = dma.done.wait [#allocation4], 2048  }
   0x6   :  { %183 = vsyncadd [#allocation4], 4294965248  ;;  %v33_v0 = vld [vmem:[#allocation3] sm:$0xff]  ;;  %v34_v1 = vld [vmem:[#allocation3 + $0x8] sm:$0xff]  ;;  %s189_s0 = smov [#allocation6]   ;;  %s118_s16 = sshll.u32 %s207_s1, 4  ;;  %s119_s16 = int_to_ptr.hbm [resolvable:$true] %s118_s16 }
   0x7   :  { %v35_v2 = vld [vmem:[#allocation3 + $0x10] sm:$0xff]  ;;  %v36_v3 = vld [vmem:[#allocation3 + $0x18] sm:$0xff]  ;;  %v37_v4 = vld [vmem:[#allocation3 + $0x20] sm:$0xff]  ;;  %v49_v6 = vmul.f32 %v33_v0, %v33_v0  ;;  %v50_v7 = vmul.f32 %v34_v1, %v34_v1  ;;  %s116_s13 = sshll.u32 %s189_s0, 4  ;;  %vm109_vm0 = vcmask 0   ;;  %s117_s13 = int_to_ptr.vmem [resolvable:$true] %s116_s13 }
   0x8   :  { %v38_v5 = vld [vmem:[#allocation3 + $0x28] sm:$0xff]  ;;  %v39_v8 = vld [vmem:[#allocation3 + $0x30] sm:$0xff]  ;;  %v40_v9 = vld [vmem:[#allocation3 + $0x38] sm:$0xff]  ;;  %v51_v11 = vmul.f32 %v35_v2, %v35_v2  ;;  %v52_v12 = vmul.f32 %v36_v3, %v36_v3  ;;  %v53_v13 = vmul.f32 %v37_v4, %v37_v4 }
   0x9   :  { %v41_v10 = vld [vmem:[#allocation3 + $0x40] sm:$0xff]  ;;  %v54_v14 = vmul.f32 %v38_v5, %v38_v5  ;;  %v42_v15 = vld [vmem:[#allocation3 + $0x48] sm:$0xff]  ;;  %v43_v16 = vld [vmem:[#allocation3 + $0x50] sm:$0xff]  ;;  %v55_v18 = vmul.f32 %v39_v8, %v39_v8  ;;  %v56_v19 = vmul.f32 %v40_v9, %v40_v9 }
   0xa   :  { %v44_v17 = vld [vmem:[#allocation3 + $0x58] sm:$0xff]  ;;  %v57_v20 = vmul.f32 %v41_v10, %v41_v10  ;;  %v45_v21 = vld [vmem:[#allocation3 + $0x60] sm:$0xff]  ;;  %v46_v22 = vld [vmem:[#allocation3 + $0x68] sm:$0xff]  ;;  %v58_v24 = vmul.f32 %v42_v15, %v42_v15  ;;  %v59_v25 = vmul.f32 %v43_v16, %v43_v16  ;;  %v69_v27 = vadd.f32 %v53_v13, %v49_v6 }
   0xb   :  { %v47_v23 = vld [vmem:[#allocation3 + $0x70] sm:$0xff]  ;;  %v60_v26 = vmul.f32 %v44_v17, %v44_v17  ;;  %v48_v28 = vld [vmem:[#allocation3 + $0x78] sm:$0xff]  ;;  %v61_v29 = vmul.f32 %v45_v21, %v45_v21  ;;  %v62_v30 = vmul.f32 %v46_v22, %v46_v22  ;;  %v72_v31 = vadd.f32 %v54_v14, %v50_v7 }
   0xc   :  { %v63_v32 = vmul.f32 %v47_v23, %v47_v23  ;;  %v70_v33 = vadd.f32 %v69_v27, %v57_v20  ;;  %v75_v34 = vadd.f32 %v55_v18, %v51_v11  ;;  %v78_v35 = vadd.f32 %v56_v19, %v52_v12 }
   0xd   :  { %v64_v36 = vmul.f32 %v48_v28, %v48_v28  ;;  %v73_v37 = vadd.f32 %v72_v31, %v58_v24 }
   0xe   :  { %v71_v38 = vadd.f32 %v70_v33, %v61_v29  ;;  %v76_v39 = vadd.f32 %v75_v34, %v59_v25  ;;  %v79_v40 = vadd.f32 %v78_v35, %v60_v26 }
   0xf   :  { %v74_v41 = vadd.f32 %v73_v37, %v62_v30 }
  0x10   :  { %v77_v42 = vadd.f32 %v76_v39, %v63_v32  ;;  %v80_v43 = vadd.f32 %v79_v40, %v64_v36 }
  0x11   :  { %v96_v44 = vadd.f32 %v74_v41, %v71_v38 }
  0x13   :  { %v97_v45 = vadd.f32 %v96_v44, %v77_v42 }
  0x15   :  { %v98_v46 = vadd.f32 %v97_v45, %v80_v43 }
  0x17   :  { %99 = vadd.xlane.f32.xlu0 %v98_v46 }
  0x8a   :  { %v100_v47 = vpop.xlane.xlu0 %99 }
  0x8b   :  { %v101_v48 = vrot.slane %v100_v47, 4 }
  0x8d   :  { %v102_v49 = vadd.f32 %v101_v48, %v100_v47 }
  0x8f   :  { %v103_v50 = vrot.slane %v102_v49, 2 }
  0x91   :  { %v104_v51 = vadd.f32 %v103_v50, %v102_v49 }
  0x93   :  { %v105_v52 = vrot.slane %v104_v51, 1 }
  0x95   :  { %v106_v53 = vadd.f32 %v105_v52, %v104_v51 }
  0x97   :  { %128 = vpush %v106_v53 }
  0xc8   :  { %s129_s17 = spop %128 }
  0xc9   :  { %v108_v54 = vstv %s129_s17 }
  0xca   :  { %110 = vst.msk [vmem:[#allocation6] sm:$0x1] %vm109_vm0, %v108_v54 }
  0xcb   :  { %121 = dma.vmem_to_hbm [thread:$0]  %s117_s13, 16, %s119_s16, [#allocation5]  }
  0xcc   :  { %184 = dma.done.wait [#allocation5], 16  }
  0xcd   :  { %185 = vsyncadd [#allocation5], 4294967280 }
  0xce   :  { %126 = vsyncpa [#allocation4], 1 }
  0xcf   :  { %127 = vsyncpa [#allocation5], 1 }

</bundles_post_ra>
